<compile_context>
chip_gen: v7x
topology: tpu7x:2x2x1
jax: 0.10.0
libtpu: 0.0.40
codegen_flags: <defaults>
</compile_context>

<pallas_src>
import functools

import jax
import jax.numpy as jnp
from jax.experimental import pallas as pl
from jax.experimental.pallas import tpu as pltpu

_LANE = 128        # lane width; node/feature alignment for dense MXU tiles
_DROP_BITS = 24    # resolution of the integer dropout threshold


def _round_up(v, m):
    return (v + m - 1) // m * m


def _vmem_capacity_bytes():
    """Chip-aware physical VMEM per core; conservative fallback off-TPU."""
    try:
        cap = int(pltpu.get_tpu_info().vmem_capacity_bytes)
        if cap > 0:
            return cap
    except Exception:
        pass
    return 64 << 20   # v7x-sized conservative default


def _pad2d(a, rows, cols, dtype):
    a = a.astype(dtype)
    if a.shape == (rows, cols):
        return a          # skip the extra HBM copy when already aligned
    return jnp.zeros((rows, cols), dtype).at[: a.shape[0], : a.shape[1]].set(a)


# ---------------------------------------------------------------------------
# Fused whole-graph kernel (everything VMEM resident, grid-less).
# ---------------------------------------------------------------------------
def _gcn_fused_kernel(*refs, l1_adj_first, l2_adj_first, use_dropout,
                      keep_threshold, inv_keep, mxu_dtype):
    if use_dropout:
        bits_ref, refs = refs[0], refs[1:]
    x_ref, adj_ref, w1_ref, b1_ref, w2_ref, b2_ref, o_ref = refs
    f32 = jnp.float32
    adj = adj_ref[...]

    # ---- layer 1: h = relu(adj @ x @ W1 + b1) -----------------------------
    if l1_adj_first:
        ax = jnp.dot(adj, x_ref[...], preferred_element_type=f32)
        h = jnp.dot(ax.astype(mxu_dtype), w1_ref[...], preferred_element_type=f32)
    else:
        xw = jnp.dot(x_ref[...], w1_ref[...], preferred_element_type=f32)
        h = jnp.dot(adj, xw.astype(mxu_dtype), preferred_element_type=f32)
    h = jnp.maximum(h + b1_ref[...], 0.0)

    # ---- dropout (training): single integer-threshold compare + select ----
    if use_dropout:
        keep = bits_ref[...] < jnp.int32(keep_threshold)
        h = jnp.where(keep, h * jnp.float32(inv_keep), jnp.float32(0.0))

    # ---- layer 2: out = adj @ h @ W2 + b2 ----------------------------------
    # h stays a live VMEM value: no scratch store/load round-trip.
    hm = h.astype(mxu_dtype)
    if l2_adj_first:
        ah = jnp.dot(adj, hm, preferred_element_type=f32)
        out = jnp.dot(ah.astype(mxu_dtype), w2_ref[...], preferred_element_type=f32)
    else:
        hw = jnp.dot(hm, w2_ref[...], preferred_element_type=f32)
        out = jnp.dot(adj, hw.astype(mxu_dtype), preferred_element_type=f32)
    o_ref[...] = (out + b2_ref[...]).astype(o_ref.dtype)


# ---------------------------------------------------------------------------
# Tiled kernel: streams adj row/column blocks over a 1-D reduction grid.
# ---------------------------------------------------------------------------
def _gcn_tiled_kernel(*refs, l1_weight_first, l2_adj_first, use_dropout,
                      keep_threshold, inv_keep, mxu_dtype):
    idx = 0
    if use_dropout:
        bits_ref = refs[idx]
        idx += 1
    (x_ref, adj_row_ref, adj_col_ref, w1_ref, b1_ref, w2_ref, b2_ref,
     o_ref, acc_ref) = refs[idx:idx + 9]
    idx += 9
    xw_ref = refs[idx] if l1_weight_first else None

    f32 = jnp.float32
    j = pl.program_id(0)

    @pl.when(j == 0)
    def _init():
        acc_ref[...] = jnp.zeros_like(acc_ref)
        if l1_weight_first:
            # x @ W1 is computed once and reused by every row block.
            xw_ref[...] = jnp.dot(x_ref[...], w1_ref[...],
                                  preferred_element_type=f32).astype(xw_ref.dtype)

    adj_rows = adj_row_ref[...]                       # (tb, N) row block of adj
    if l1_weight_first:
        h = jnp.dot(adj_rows, xw_ref[...], preferred_element_type=f32)
    else:
        ax = jnp.dot(adj_rows, x_ref[...], preferred_element_type=f32)
        h = jnp.dot(ax.astype(mxu_dtype), w1_ref[...], preferred_element_type=f32)
    h = jnp.maximum(h + b1_ref[...], 0.0)

    if use_dropout:
        keep = bits_ref[...] < jnp.int32(keep_threshold)
        h = jnp.where(keep, h * jnp.float32(inv_keep), jnp.float32(0.0))

    adj_cols = adj_col_ref[...]                       # (N, tb) column block of adj
    if l2_adj_first:
        # Accumulate adj @ h ; multiply by W2 once at the end (nhid < nout).
        acc_ref[...] += jnp.dot(adj_cols, h.astype(mxu_dtype),
                                preferred_element_type=f32)
    else:
        hw = jnp.dot(h.astype(mxu_dtype), w2_ref[...], preferred_element_type=f32)
        acc_ref[...] += jnp.dot(adj_cols, hw.astype(mxu_dtype),
                                preferred_element_type=f32)

    @pl.when(j == pl.num_programs(0) - 1)
    def _finalize():
        if l2_adj_first:
            out = jnp.dot(acc_ref[...].astype(mxu_dtype), w2_ref[...],
                          preferred_element_type=f32)
        else:
            out = acc_ref[...]
        o_ref[...] = (out + b2_ref[...]).astype(o_ref.dtype)


# ---------------------------------------------------------------------------
# Wrapper
# ---------------------------------------------------------------------------
def gcn_forward(x, adj, params, dropout_rate=0.5, training=False, seed=0,
                mxu_dtype=jnp.bfloat16, force_tiled=False, max_tile_rows=None):
    """Fused GCN forward:  adj @ dropout(relu(adj @ x @ W1 + b1)) @ W2 + b2.

    `seed` only matters in training mode; callers must vary it per step or the
    same dropout mask is reproduced.
    """
    n, nfeat = x.shape
    nhid = params["w1"].shape[1]
    nout = params["w2"].shape[1]
    out_dtype = x.dtype

    # Lane/MXU-dense padding: node and feature dims -> multiples of 128.
    n_pad = _round_up(n, _LANE)
    f_pad = _round_up(nfeat, _LANE)
    h_pad = _round_up(nhid, _LANE)
    o_pad = _round_up(nout, _LANE)

    # Big MXU operands are stored/streamed in the MXU dtype (default bf16:
    # halves adj's HBM/VMEM footprint; f32 accumulation keeps accuracy).
    xp = _pad2d(x, n_pad, f_pad, mxu_dtype)
    adjp = _pad2d(adj, n_pad, n_pad, mxu_dtype)
    w1p = _pad2d(params["w1"], f_pad, h_pad, mxu_dtype)
    w2p = _pad2d(params["w2"], h_pad, o_pad, mxu_dtype)
    b1p = _pad2d(params["b1"].reshape(1, -1), 1, h_pad, jnp.float32)
    b2p = _pad2d(params["b2"].reshape(1, -1), 1, o_pad, jnp.float32)

    # Dropout setup (training only): host-side random bits, in-kernel integer
    # threshold compare (no float cast / multiply over the hidden tile).
    keep_prob = 1.0 - float(dropout_rate)
    use_dropout = bool(training) and keep_prob < 1.0
    threshold, inv_keep, bits = 0, 0.0, None
    if use_dropout:
        threshold = max(0, min(1 << _DROP_BITS,
                               int(round(keep_prob * (1 << _DROP_BITS)))))
        inv_keep = (1.0 / keep_prob) if keep_prob > 0.0 else 0.0
        raw = jax.random.bits(jax.random.PRNGKey(int(seed)), (n_pad, h_pad),
                              jnp.uint32)
        bits = (raw >> (32 - _DROP_BITS)).astype(jnp.int32)

    # Static per-layer matmul order: contract adj over the narrower width.
    l1_adj_first = nfeat <= nhid
    l2_adj_first = nhid < nout

    mxu_bytes = jnp.dtype(mxu_dtype).itemsize
    out_bytes = jnp.dtype(out_dtype).itemsize
    vmem_cap = _vmem_capacity_bytes()
    budget = (vmem_cap * 7) // 10        # headroom for compiler temporaries

    # Fused-path footprint, in-kernel intermediates included.
    fused_bytes = (n_pad * n_pad + n_pad * f_pad + f_pad * h_pad
                   + h_pad * o_pad) * mxu_bytes
    fused_bytes += (h_pad + o_pad) * 4 + n_pad * o_pad * out_bytes
    fused_bytes += n_pad * (f_pad + 2 * h_pad + 2 * o_pad) * 4   # ax/xw, h, ah/hw, f32 out
    fused_bytes += n_pad * (h_pad + o_pad) * mxu_bytes           # MXU re-cast copies
    if use_dropout:
        fused_bytes += n_pad * h_pad * 4

    def _cost(adj_reads):
        if l1_adj_first:
            fl1 = 2 * n_pad * n_pad * f_pad + 2 * n_pad * f_pad * h_pad
        else:
            fl1 = 2 * n_pad * f_pad * h_pad + 2 * n_pad * n_pad * h_pad
        if l2_adj_first:
            fl2 = 2 * n_pad * n_pad * h_pad + 2 * n_pad * h_pad * o_pad
        else:
            fl2 = 2 * n_pad * h_pad * o_pad + 2 * n_pad * n_pad * o_pad
        by = (adj_reads * n_pad * n_pad + n_pad * f_pad + f_pad * h_pad
              + h_pad * o_pad) * mxu_bytes
        by += (h_pad + o_pad) * 4 + n_pad * o_pad * out_bytes
        if use_dropout:
            by += n_pad * h_pad * 4
        return pl.CostEstimate(flops=int(fl1 + fl2), transcendentals=0,
                               bytes_accessed=int(by))

    vspec = pl.BlockSpec(memory_space=pltpu.MemorySpace.VMEM)

    if not force_tiled and fused_bytes <= budget:
        # ------------- fused, whole graph VMEM resident ---------------------
        vmem_limit = int(min(fused_bytes + (16 << 20), (vmem_cap * 9) // 10))
        kernel = functools.partial(
            _gcn_fused_kernel, l1_adj_first=l1_adj_first,
            l2_adj_first=l2_adj_first, use_dropout=use_dropout,
            keep_threshold=threshold, inv_keep=inv_keep, mxu_dtype=mxu_dtype)
        args, in_specs = [], []
        if use_dropout:
            args.append(bits)
            in_specs.append(vspec)
        args += [xp, adjp, w1p, b1p, w2p, b2p]
        in_specs += [vspec] * 6
        out_p = pl.pallas_call(
            kernel,
            out_shape=jax.ShapeDtypeStruct((n_pad, o_pad), out_dtype),
            in_specs=in_specs,
            out_specs=vspec,
            compiler_params=pltpu.CompilerParams(vmem_limit_bytes=vmem_limit),
            cost_estimate=_cost(adj_reads=1),
        )(*args)
        return out_p[:n, :nout]

    # ------------------ tiled / streamed-adjacency path ---------------------
    l1_weight_first = not l1_adj_first
    acc_cols = h_pad if l2_adj_first else o_pad

    def _tiled_bytes(tb):
        resident = (n_pad * f_pad + f_pad * h_pad + h_pad * o_pad) * mxu_bytes
        resident += (h_pad + o_pad) * 4
        resident += n_pad * acc_cols * 4 + n_pad * o_pad * out_bytes
        if l1_weight_first:
            resident += n_pad * h_pad * mxu_bytes
        stream = 2 * 2 * tb * n_pad * mxu_bytes       # adj row+col tiles, 2x buffered
        if use_dropout:
            stream += 2 * tb * h_pad * 4
        inter = tb * (f_pad + 2 * h_pad + 2 * o_pad) * 4
        return resident + stream + inter

    tb = None
    for cand in (512, 256, 128):
        if max_tile_rows is not None and cand > max_tile_rows:
            continue
        if n_pad % cand == 0 and _tiled_bytes(cand) <= budget:
            tb = cand
            break
    if tb is None:
        # TODO(synk): tile x / accumulator columns for graphs whose resident
        # state alone exceeds VMEM.
        raise NotImplementedError(
            "graph too large for the streamed-adjacency kernel "
            f"(needs ~{_tiled_bytes(128) >> 20} MiB resident VMEM)")

    vmem_limit = int(min(_tiled_bytes(tb) + (16 << 20), (vmem_cap * 9) // 10))
    kernel = functools.partial(
        _gcn_tiled_kernel, l1_weight_first=l1_weight_first,
        l2_adj_first=l2_adj_first, use_dropout=use_dropout,
        keep_threshold=threshold, inv_keep=inv_keep, mxu_dtype=mxu_dtype)

    args, in_specs = [], []
    if use_dropout:
        args.append(bits)
        in_specs.append(pl.BlockSpec((tb, h_pad), lambda j: (j, 0)))
    args += [xp, adjp, adjp, w1p, b1p, w2p, b2p]
    in_specs += [
        pl.BlockSpec((n_pad, f_pad), lambda j: (0, 0)),   # x   (VMEM resident)
        pl.BlockSpec((tb, n_pad), lambda j: (j, 0)),      # adj row block
        pl.BlockSpec((n_pad, tb), lambda j: (0, j)),      # adj column block
        pl.BlockSpec((f_pad, h_pad), lambda j: (0, 0)),   # W1
        pl.BlockSpec((1, h_pad), lambda j: (0, 0)),       # b1
        pl.BlockSpec((h_pad, o_pad), lambda j: (0, 0)),   # W2
        pl.BlockSpec((1, o_pad), lambda j: (0, 0)),       # b2
    ]
    scratch = [pltpu.VMEM((n_pad, acc_cols), jnp.float32)]
    if l1_weight_first:
        scratch.append(pltpu.VMEM((n_pad, h_pad), mxu_dtype))

    out_p = pl.pallas_call(
        kernel,
        out_shape=jax.ShapeDtypeStruct((n_pad, o_pad), out_dtype),
        grid=(n_pad // tb,),
        in_specs=in_specs,
        out_specs=pl.BlockSpec((n_pad, o_pad), lambda j: (0, 0)),
        scratch_shapes=scratch,
        compiler_params=pltpu.CompilerParams(
            # TODO(synk): a 2-pass per-layer variant would make this axis
            # "parallel" so v7x's two TensorCores split the rows; here it is
            # the layer-2 reduction axis.
            dimension_semantics=("arbitrary",),
            vmem_limit_bytes=vmem_limit),
        cost_estimate=_cost(adj_reads=2),
    )(*args)
    return out_p[:n, :nout]


def init_gcn_params(key, nfeat, nhid, nout, dtype=jnp.float32):
    """Mirrors GraphConvolution.reset_parameters:
    uniform(-stdv, stdv) with stdv = 1/sqrt(out_features)."""
    k1, k2, k3, k4 = jax.random.split(key, 4)
    stdv1 = 1.0 / jnp.sqrt(jnp.array(nhid, dtype))
    stdv2 = 1.0 / jnp.sqrt(jnp.array(nout, dtype))
    return {
        "w1": jax.random.uniform(k1, (nfeat, nhid), dtype, -stdv1, stdv1),
        "b1": jax.random.uniform(k2, (1, nhid), dtype, -stdv1, stdv1),
        "w2": jax.random.uniform(k3, (nhid, nout), dtype, -stdv2, stdv2),
        "b2": jax.random.uniform(k4, (1, nout), dtype, -stdv2, stdv2),
    }


def _reference_forward(x, adj, p):
    h = jnp.maximum(adj @ (x @ p["w1"]) + p["b1"], 0.0)
    return adj @ (h @ p["w2"]) + p["b2"]


def _make_graph(kx, kadj, n, nfeat, density_gt):
    x = jax.random.normal(kx, (n, nfeat), jnp.float32)
    a = (jax.random.uniform(kadj, (n, n)) > density_gt).astype(jnp.float32)
    a = jnp.maximum(a, a.T) + jnp.eye(n, dtype=jnp.float32)
    dinv = 1.0 / jnp.sqrt(a.sum(axis=1))
    adj = a * dinv[:, None] * dinv[None, :]
    return x, adj


if __name__ == "__main__":
    DROPOUT = 0.5
    key = jax.random.PRNGKey(0)
    (kx, kadj, kp, kseed, k2x, k2a, k2p) = jax.random.split(key, 7)

    # ---- small graph: fused whole-graph path (eval + training) -------------
    N, NFEAT, NHID, NOUT = 8, 16, 32, 8
    x, adj = _make_graph(kx, kadj, N, NFEAT, 0.6)
    params = init_gcn_params(kp, NFEAT, NHID, NOUT)

    out = jax.block_until_ready(
        gcn_forward(x, adj, params, DROPOUT, training=False))
    ref = _reference_forward(x, adj, params)
    assert out.shape == (N, NOUT)
    assert jnp.allclose(out, ref, atol=5e-2, rtol=5e-2), (
        float(jnp.max(jnp.abs(out - ref))))

    seed = int(jax.random.randint(kseed, (), 0, 2 ** 31 - 1))
    out_tr = jax.block_until_ready(
        gcn_forward(x, adj, params, DROPOUT, training=True, seed=seed))
    assert out_tr.shape == (N, NOUT)
    assert bool(jnp.all(jnp.isfinite(out_tr)))

    # ---- larger graph: streamed-adjacency tiled path (forced) --------------
    N2, F2, H2, O2 = 256, 48, 96, 16
    x2, adj2 = _make_graph(k2x, k2a, N2, F2, 0.9)
    params2 = init_gcn_params(k2p, F2, H2, O2)

    out_fused = jax.block_until_ready(
        gcn_forward(x2, adj2, params2, DROPOUT, training=False))
    out_tiled = jax.block_until_ready(
        gcn_forward(x2, adj2, params2, DROPOUT, training=False,
                    force_tiled=True, max_tile_rows=128))
    ref2 = _reference_forward(x2, adj2, params2)
    assert out_tiled.shape == (N2, O2)
    assert jnp.allclose(out_tiled, out_fused, atol=1e-2, rtol=1e-2), (
        float(jnp.max(jnp.abs(out_tiled - out_fused))))
    assert jnp.allclose(out_tiled, ref2, atol=5e-2, rtol=5e-2), (
        float(jnp.max(jnp.abs(out_tiled - ref2))))

    print("KERNEL_OK")
</pallas_src>

<mosaic_0001>
module attributes {stable_mosaic.version = 11 : i64} {
  func.func @_gcn_fused_kernel(%arg0: memref<128x128xbf16, #tpu.memory_space<vmem>>, %arg1: memref<128x128xbf16, #tpu.memory_space<vmem>>, %arg2: memref<128x128xbf16, #tpu.memory_space<vmem>>, %arg3: memref<1x128xf32, #tpu.memory_space<vmem>>, %arg4: memref<128x128xbf16, #tpu.memory_space<vmem>>, %arg5: memref<1x128xf32, #tpu.memory_space<vmem>>, %arg6: memref<128x128xf32, #tpu.memory_space<vmem>>) attributes {dimension_semantics = [], scalar_prefetch = 0 : i64, scratch_operands = 0 : i64, tpu.core_type = #tpu.core_type<tc>} {
    %c0 = arith.constant 0 : index
    %c0_0 = arith.constant 0 : index
    %0 = vector.load %arg1[%c0, %c0_0] : memref<128x128xbf16, #tpu.memory_space<vmem>>, vector<128x128xbf16>
    %c0_1 = arith.constant 0 : index
    %c0_2 = arith.constant 0 : index
    %1 = vector.load %arg0[%c0_1, %c0_2] : memref<128x128xbf16, #tpu.memory_space<vmem>>, vector<128x128xbf16>
    %cst = arith.constant dense<0.000000e+00> : vector<128x128xf32>
    %2 = tpu.matmul %0, %1, %cst {dimension_numbers = #tpu.dot_dimension_numbers<[1], [0], [0], [1], [0, 0, 1, 1], [], []>} : vector<128x128xbf16>, vector<128x128xbf16>, vector<128x128xf32> -> vector<128x128xf32>
    %3 = arith.truncf %2 : vector<128x128xf32> to vector<128x128xbf16>
    %c0_3 = arith.constant 0 : index
    %c0_4 = arith.constant 0 : index
    %4 = vector.load %arg2[%c0_3, %c0_4] : memref<128x128xbf16, #tpu.memory_space<vmem>>, vector<128x128xbf16>
    %cst_5 = arith.constant dense<0.000000e+00> : vector<128x128xf32>
    %5 = tpu.matmul %3, %4, %cst_5 {dimension_numbers = #tpu.dot_dimension_numbers<[1], [0], [0], [1], [0, 0, 1, 1], [], []>} : vector<128x128xbf16>, vector<128x128xbf16>, vector<128x128xf32> -> vector<128x128xf32>
    %c0_6 = arith.constant 0 : index
    %c0_7 = arith.constant 0 : index
    %6 = vector.load %arg3[%c0_6, %c0_7] : memref<1x128xf32, #tpu.memory_space<vmem>>, vector<1x128xf32>
    %7 = vector.broadcast %6 : vector<1x128xf32> to vector<128x128xf32>
    %8 = arith.addf %5, %7 : vector<128x128xf32>
    %cst_8 = arith.constant 0.000000e+00 : f32
    %9 = vector.broadcast %cst_8 : f32 to vector<128x128xf32>
    %10 = arith.maximumf %8, %9 : vector<128x128xf32>
    %11 = arith.truncf %10 : vector<128x128xf32> to vector<128x128xbf16>
    %c0_9 = arith.constant 0 : index
    %c0_10 = arith.constant 0 : index
    %12 = vector.load %arg4[%c0_9, %c0_10] : memref<128x128xbf16, #tpu.memory_space<vmem>>, vector<128x128xbf16>
    %cst_11 = arith.constant dense<0.000000e+00> : vector<128x128xf32>
    %13 = tpu.matmul %11, %12, %cst_11 {dimension_numbers = #tpu.dot_dimension_numbers<[1], [0], [0], [1], [0, 0, 1, 1], [], []>} : vector<128x128xbf16>, vector<128x128xbf16>, vector<128x128xf32> -> vector<128x128xf32>
    %14 = arith.truncf %13 : vector<128x128xf32> to vector<128x128xbf16>
    %cst_12 = arith.constant dense<0.000000e+00> : vector<128x128xf32>
    %15 = tpu.matmul %0, %14, %cst_12 {dimension_numbers = #tpu.dot_dimension_numbers<[1], [0], [0], [1], [0, 0, 1, 1], [], []>} : vector<128x128xbf16>, vector<128x128xbf16>, vector<128x128xf32> -> vector<128x128xf32>
    %c0_13 = arith.constant 0 : index
    %c0_14 = arith.constant 0 : index
    %16 = vector.load %arg5[%c0_13, %c0_14] : memref<1x128xf32, #tpu.memory_space<vmem>>, vector<1x128xf32>
    %17 = vector.broadcast %16 : vector<1x128xf32> to vector<128x128xf32>
    %18 = arith.addf %15, %17 : vector<128x128xf32>
    %c0_15 = arith.constant 0 : index
    %c0_16 = arith.constant 0 : index
    %19 = vector.load %arg6[%c0_15, %c0_16] : memref<128x128xf32, #tpu.memory_space<vmem>>, vector<128x128xf32>
    tpu.vector_store %arg6[%c0_15, %c0_16], %18 {strides = array<i32>} : memref<128x128xf32, #tpu.memory_space<vmem>>, vector<128x128xf32>,
    return
  }
}

</mosaic_0001>

<bundles_post_ra>
// kernel: tpu_custom_call.1
= control target key start
LH: loop header
LB: loop body
LE: loop exit
PB: predicated region body
PF: predicated region fallthrough
CT: control target
= control target key end

     0   :  { %11 = vsyncpa [#allocation3], 0  ;;  %s1366_s0 = inlined_call_operand.hbm [shape: bf16[128,128], index: 0, kind: input, shape index: {}]   ;;  %s1367_s1 = inlined_call_operand.hbm [shape: bf16[128,128], index: 1, kind: input, shape index: {}]   ;;  %s1368_s2 = inlined_call_operand.hbm [shape: bf16[128,128], index: 2, kind: input, shape index: {}]   ;;  %s1369_s3 = inlined_call_operand.vmem [shape: f32[1,128], index: 3, kind: input, shape index: {}]   ;;  %s1370_s4 = inlined_call_operand.hbm [shape: bf16[128,128], index: 4, kind: input, shape index: {}]   ;;  %s1371_s5 = inlined_call_operand.vmem [shape: f32[1,128], index: 5, kind: input, shape index: {}]   ;;  %s1372_s6 = inlined_call_operand.hbm [shape: f32[128,128], index: 6, kind: output, shape index: {}]  }
   0x1   :  { %12 = vsyncpa [#allocation6], 0 }
   0x2   :  { %13 = vsyncpa [#allocation9], 0 }
   0x3   :  { %14 = vsyncpa [#allocation4], 0  ;;  %s1198_s21 = smov [#allocation5]   ;;  %s1199_s23 = smov [#allocation2]  }
   0x4   :  { %s32_s22 = sshll.u32 %s1198_s21, 4  ;;  %s20_s24 = sshll.u32 %s1199_s23, 4  ;;  %s33_s22 = int_to_ptr.vmem [resolvable:$true] %s32_s22  ;;  %s1242_s24 = int_to_ptr.vmem [resolvable:$true] %s20_s24 }
   0x5   :  { %s1080_s27 = scalar_lea.hbm %s1367_s1, 1024 }
   0x6   :  { %p1081_p0 = scmp.ne.s32.totalorder %s1367_s1, %s1080_s27  ;;  %p1084_p1 = scmp.lt.u32.totalorder %s1080_s27, %s1367_s1 }
   0x8   :  { %p1086_p2 = pnand %p1084_p1, %p1081_p0 }
   0xa   :  { %1089 = shalt.err (!%p1086_p2)
}
   0xb   :  { %s1090_s8 = scalar_lea.vmem %s33_s22, 1024  ;;  %p1095_p4 = scmp.lt.s32.totalorder %s33_s22, %s33_s22 }
   0xc   :  { %p1091_p3 = scmp.ne.s32.totalorder %s33_s22, %s1090_s8  ;;  %p1096_p5 = scmp.lt.s32.totalorder %s1090_s8, %s1090_s8 }
   0xe   :  { %p1097_p6 = por %p1096_p5, %p1095_p4 }
  0x10   :  { %p1098_p7 = pnand %p1097_p6, %p1091_p3 }
  0x12   :  { %1101 = shalt.err (!%p1098_p7)
}
  0x13   :  { %s1200_s9 = smov 64   ;;  %s1201_s10 = smov 4  }
  0x14   :  { %38 = dma.hbm_to_vmem [thread:$0]  %s1367_s1, 1024, %s33_s22, [#allocation6], %s1200_s9, %s1200_s9, %s1201_s10  }
  0x15   :  { %s1102_s15 = scalar_lea.hbm %s1366_s0, 1024 }
  0x16   :  { %p1103_p8 = scmp.ne.s32.totalorder %s1366_s0, %s1102_s15  ;;  %p1106_p9 = scmp.lt.u32.totalorder %s1102_s15, %s1366_s0 }
  0x18   :  { %p1108_p10 = pnand %p1106_p9, %p1103_p8 }
  0x1a   :  { %1111 = shalt.err (!%p1108_p10)
}
  0x1b   :  { %s1112_s20 = scalar_lea.vmem %s1242_s24, 1024  ;;  %p1117_p12 = scmp.lt.s32.totalorder %s1242_s24, %s1242_s24 }
  0x1c   :  { %p1113_p11 = scmp.ne.s32.totalorder %s1242_s24, %s1112_s20  ;;  %p1118_p13 = scmp.lt.s32.totalorder %s1112_s20, %s1112_s20 }
  0x1e   :  { %p1119_p0 = por %p1118_p13, %p1117_p12 }
  0x20   :  { %p1120_p1 = pnand %p1119_p0, %p1113_p11 }
  0x22   :  { %1123 = shalt.err (!%p1120_p1)
}
  0x23   :  { %26 = dma.hbm_to_vmem [thread:$0]  %s1366_s0, 1024, %s1242_s24, [#allocation3], %s1200_s9, %s1200_s9, %s1201_s10  }
  0x24   :  { %s1202_s22 = smov [#allocation7]   ;;  %s1203_s25 = smov [#allocation8]  }
  0x25   :  { %s44_s23 = sshll.u32 %s1202_s22, 4  ;;  %s58_s26 = sshll.u32 %s1203_s25, 4  ;;  %s45_s23 = int_to_ptr.vmem [resolvable:$true] %s44_s23  ;;  %s1279_s26 = int_to_ptr.vmem [resolvable:$true] %s58_s26 }
  0x26   :  { %s1124_s29 = scalar_lea.hbm %s1368_s2, 1024 }
  0x27   :  { %p1125_p2 = scmp.ne.s32.totalorder %s1368_s2, %s1124_s29  ;;  %p1128_p3 = scmp.lt.u32.totalorder %s1124_s29, %s1368_s2 }
  0x29   :  { %p1130_p4 = pnand %p1128_p3, %p1125_p2 }
  0x2b   :  { %1133 = shalt.err (!%p1130_p4)
}
  0x2c   :  { %s1134_s0 = scalar_lea.vmem %s45_s23, 1024  ;;  %p1139_p6 = scmp.lt.s32.totalorder %s45_s23, %s45_s23 }
  0x2d   :  { %p1135_p5 = scmp.ne.s32.totalorder %s45_s23, %s1134_s0  ;;  %p1140_p7 = scmp.lt.s32.totalorder %s1134_s0, %s1134_s0 }
  0x2f   :  { %p1141_p8 = por %p1140_p7, %p1139_p6 }
  0x31   :  { %p1142_p9 = pnand %p1141_p8, %p1135_p5 }
  0x33   :  { %1145 = shalt.err (!%p1142_p9)
}
  0x34   :  { %50 = dma.hbm_to_vmem [thread:$0]  %s1368_s2, 1024, %s45_s23, [#allocation6], %s1200_s9, %s1200_s9, %s1201_s10  }
  0x35   :  { %s1146_s15 = scalar_lea.hbm %s1370_s4, 1024 }
  0x36   :  { %p1147_p10 = scmp.ne.s32.totalorder %s1370_s4, %s1146_s15  ;;  %p1150_p11 = scmp.lt.u32.totalorder %s1146_s15, %s1370_s4 }
  0x38   :  { %p1152_p12 = pnand %p1150_p11, %p1147_p10 }
  0x3a   :  { %1155 = shalt.err (!%p1152_p12)
}
  0x3b   :  { %s1156_s20 = scalar_lea.vmem %s1279_s26, 1024  ;;  %p1161_p0 = scmp.lt.s32.totalorder %s1279_s26, %s1279_s26 }
  0x3c   :  { %p1157_p13 = scmp.ne.s32.totalorder %s1279_s26, %s1156_s20  ;;  %p1162_p1 = scmp.lt.s32.totalorder %s1156_s20, %s1156_s20 }
  0x3e   :  { %p1163_p2 = por %p1162_p1, %p1161_p0 }
  0x40   :  { %p1164_p3 = pnand %p1163_p2, %p1157_p13 }
  0x42   :  { %1167 = shalt.err (!%p1164_p3)
}
  0x43   :  { %64 = dma.hbm_to_vmem [thread:$0]  %s1370_s4, 1024, %s1279_s26, [#allocation9], %s1200_s9, %s1200_s9, %s1201_s10  }
  0x44   :  { %1190 = dma.done.wait [#allocation3], 1024  }
  0x45   :  { %1191 = vsyncadd [#allocation3], 4294966272 }
  0x46   :  { %1192 = dma.done.wait [#allocation6], 2048  }
  0x47   :  { %1193 = vsyncadd [#allocation6], 4294965248 }
  0x48   :  { %1194 = dma.done.wait [#allocation9], 1024  }
  0x49   :  { %1195 = vsyncadd [#allocation9], 4294966272  ;;  %v1048_v0 = vld [vmem:[#allocation2] sm:$0xff]   ;;  %v1049_v1 = vld [vmem:[#allocation2 + $0x8] sm:$0xff]  }
  0x4a   :  { %911 = vmatprep.subr.bf16.mxu0 %v1048_v0  ;;  %v1050_v2 = vld [vmem:[#allocation2 + $0x10] sm:$0xff]   ;;  %v1051_v3 = vld [vmem:[#allocation2 + $0x18] sm:$0xff]   ;;  %v1316_v4 = vld [vmem:[#allocation5] sm:$0xff]  }
  0x4b   :  { %912 = vmatpush3.bf16.msra.mxu0 %v1048_v0  ;;  %927 = vmatprep.mubr.bf16.mxu0 %v1316_v4  ;;  %v1052_v5 = vld [vmem:[#allocation2 + $0x20] sm:$0xff]   ;;  %v1053_v6 = vld [vmem:[#allocation2 + $0x28] sm:$0xff]   ;;  %v1054_v9 = vld [vmem:[#allocation2 + $0x30] sm:$0xff]  }
  0x4c   :  { %913 = vmatprep.subr.bf16.mxu0 %v1049_v1  ;;  %v1064_v7 = vld [vmem:[#allocation7] sm:$0xff]   ;;  %v1065_v8 = vld [vmem:[#allocation7 + $0x8] sm:$0xff]   ;;  %v1066_v10 = vld [vmem:[#allocation7 + $0x10] sm:$0xff]  }
  0x4d   :  { %943 = vmatprep.subr.bf16.mxu1 %v1064_v7  ;;  %v1055_v11 = vld [vmem:[#allocation2 + $0x38] sm:$0xff]   ;;  %v1068_v13 = vld [vmem:[#allocation7 + $0x20] sm:$0xff]   ;;  %v1319_v14 = vld [vmem:[#allocation5 + $0x8] sm:$0xff]  }
  0x4e   :  { %944 = vmatpush3.bf16.msra.mxu1 %v1064_v7  ;;  %v1067_v12 = vld [vmem:[#allocation7 + $0x18] sm:$0xff]   ;;  %v1321_v15 = vld [vmem:[#allocation5 + $0x10] sm:$0xff]   ;;  %v1069_v16 = vld [vmem:[#allocation7 + $0x28] sm:$0xff]  }
  0x4f   :  { %914 = vmatpush3.bf16.msra.mxu0 %v1049_v1  ;;  %945 = vmatprep.subr.bf16.mxu1 %v1065_v8  ;;  %v1070_v17 = vld [vmem:[#allocation7 + $0x30] sm:$0xff]   ;;  %v1325_v18 = vld [vmem:[#allocation5 + $0x18] sm:$0xff]   ;;  %v1327_v19 = vld [vmem:[#allocation5 + $0x20] sm:$0xff]  }
  0x50   :  { %915 = vmatprep.subr.bf16.mxu0 %v1050_v2  ;;  %v1331_v20 = vld [vmem:[#allocation5 + $0x28] sm:$0xff]   ;;  %v1333_v21 = vld [vmem:[#allocation5 + $0x30] sm:$0xff]   ;;  %v1337_v22 = vld [vmem:[#allocation5 + $0x38] sm:$0xff]  }
  0x51   :  { %v1071_v23 = vld [vmem:[#allocation7 + $0x38] sm:$0xff]   ;;  %v1072_v24 = vld [vmem:[#allocation8] sm:$0xff]   ;;  %v1073_v25 = vld [vmem:[#allocation8 + $0x8] sm:$0xff]  }
  0x52   :  { %946 = vmatpush3.bf16.msra.mxu1 %v1065_v8  ;;  %v1074_v26 = vld [vmem:[#allocation8 + $0x10] sm:$0xff]   ;;  %v1075_v27 = vld [vmem:[#allocation8 + $0x18] sm:$0xff]   ;;  %v1076_v28 = vld [vmem:[#allocation8 + $0x20] sm:$0xff]  }
  0x53   :  { %916 = vmatpush3.bf16.msra.mxu0 %v1050_v2  ;;  %947 = vmatprep.subr.bf16.mxu1 %v1066_v10  ;;  %v1077_v29 = vld [vmem:[#allocation8 + $0x28] sm:$0xff]   ;;  %v1078_v54 = vld [vmem:[#allocation8 + $0x30] sm:$0xff]   ;;  %v1079_v55 = vld [vmem:[#allocation8 + $0x38] sm:$0xff]  }
  0x54   :  { %917 = vmatprep.subr.bf16.mxu0 %v1051_v3  ;;  %v829_v56 = vld [vmem:[%s1369_s3] ss:$0 sm:$0xff] }
  0x56   :  { %948 = vmatpush3.bf16.msra.mxu1 %v1066_v10 }
  0x57   :  { %918 = vmatpush3.bf16.msra.mxu0 %v1051_v3  ;;  %949 = vmatprep.subr.bf16.mxu1 %v1067_v12 }
  0x58   :  { %919 = vmatprep.subr.bf16.mxu0 %v1052_v5 }
  0x5a   :  { %950 = vmatpush3.bf16.msra.mxu1 %v1067_v12 }
  0x5b   :  { %920 = vmatpush3.bf16.msra.mxu0 %v1052_v5  ;;  %951 = vmatprep.subr.bf16.mxu1 %v1068_v13 }
  0x5c   :  { %921 = vmatprep.subr.bf16.mxu0 %v1053_v6 }
  0x5e   :  { %952 = vmatpush3.bf16.msra.mxu1 %v1068_v13 }
  0x5f   :  { %922 = vmatpush3.bf16.msra.mxu0 %v1053_v6  ;;  %953 = vmatprep.subr.bf16.mxu1 %v1069_v16 }
  0x60   :  { %923 = vmatprep.subr.bf16.mxu0 %v1054_v9 }
  0x62   :  { %954 = vmatpush3.bf16.msra.mxu1 %v1069_v16 }
  0x63   :  { %924 = vmatpush3.bf16.msra.mxu0 %v1054_v9  ;;  %955 = vmatprep.subr.bf16.mxu1 %v1070_v17 }
  0x64   :  { %925 = vmatprep.subr.bf16.mxu0 %v1055_v11 }
  0x66   :  { %956 = vmatpush3.bf16.msra.mxu1 %v1070_v17 }
  0x67   :  { %926 = vmatpush3.bf16.msra.mxu0 %v1055_v11  ;;  %957 = vmatprep.subr.bf16.mxu1 %v1071_v23 }
  0x68   :  { %975 = vmatprep.subr.bf16.mxu0 %v1072_v24 }
  0x6a   :  { %928 = vmatmul.mubr.bf16.vlgmr.msra.gmra.mrb[0].mxu0 %v1319_v14  ;;  %958 = vmatpush3.bf16.msra.mxu1 %v1071_v23 }
  0x6b   :  { %931 = vmatprep.mubr.bf16.mxu0 %v1321_v15  ;;  %976 = vmatpush3.bf16.msra.mxu0 %v1072_v24 }
  0x6c   :  { %977 = vmatprep.subr.bf16.mxu0 %v1073_v25 }
  0x6f   :  { %978 = vmatpush3.bf16.msra.mxu0 %v1073_v25 }
  0x70   :  { %979 = vmatprep.subr.bf16.mxu0 %v1074_v26 }
  0x72   :  { %932 = vmatmul.mubr.bf16.gmra.mrb[4].mxu0 %v1325_v18 }
  0x73   :  { %935 = vmatprep.mubr.bf16.mxu0 %v1327_v19  ;;  %980 = vmatpush3.bf16.msra.mxu0 %v1074_v26 }
  0x74   :  { %981 = vmatprep.subr.bf16.mxu0 %v1075_v27 }
  0x77   :  { %982 = vmatpush3.bf16.msra.mxu0 %v1075_v27 }
  0x78   :  { %983 = vmatprep.subr.bf16.mxu0 %v1076_v28 }
  0x7a   :  { %936 = vmatmul.mubr.bf16.gmra.mrb[8].mxu0 %v1331_v20 }
  0x7b   :  { %939 = vmatprep.mubr.bf16.mxu0 %v1333_v21  ;;  %984 = vmatpush3.bf16.msra.mxu0 %v1076_v28 }
  0x7c   :  { %985 = vmatprep.subr.bf16.mxu0 %v1077_v29 }
  0x7f   :  { %986 = vmatpush3.bf16.msra.mxu0 %v1077_v29 }
  0x80   :  { %987 = vmatprep.subr.bf16.mxu0 %v1078_v54 }
  0x82   :  { %940 = vmatmul.mubr.bf16.gmra.mrb[12].mxu0 %v1337_v22 }
  0x83   :  { %988 = vmatpush3.bf16.msra.mxu0 %v1078_v54 }
  0x84   :  { %989 = vmatprep.subr.bf16.mxu0 %v1079_v55 }
  0x87   :  { %990 = vmatpush3.bf16.msra.mxu0 %v1079_v55 }
 0x13d   :  { %v929_v30 = vpop.f32.mrb[0].mxu0 }
 0x13e   :  { %v242_v31 = vpop.f32.mrb[1].mxu0 }
 0x13f   :  { %v930_v32 = vpop.f32.mrb[2].mxu0 }
 0x140   :  { %v306_v33 = vpack.c.bf16 %v930_v32, %v929_v30  ;;  %v245_v34 = vpop.f32.mrb[3].mxu0 }
 0x141   :  { %v305_v35 = vpack.c.bf16 %v245_v34, %v242_v31 }
 0x143   :  { %959 = vmatprep.mubr.bf16.mxu1 %v305_v35 }
 0x144   :  { %960 = vmatmul.mubr.bf16.vlgmr.msra.gmra.mrb[0].mxu1 %v306_v33 }
 0x145   :  { %v933_v36 = vpop.f32.mrb[4].mxu0 }
 0x146   :  { %v258_v37 = vpop.f32.mrb[5].mxu0 }
 0x147   :  { %v934_v38 = vpop.f32.mrb[6].mxu0 }
 0x148   :  { %v308_v39 = vpack.c.bf16 %v934_v38, %v933_v36  ;;  %v261_v40 = vpop.f32.mrb[7].mxu0 }
 0x149   :  { %v307_v41 = vpack.c.bf16 %v261_v40, %v258_v37 }
 0x14b   :  { %963 = vmatprep.mubr.bf16.mxu1 %v307_v41 }
 0x14c   :  { %964 = vmatmul.mubr.bf16.gmra.mrb[4].mxu1 %v308_v39 }
 0x14d   :  { %v937_v42 = vpop.f32.mrb[8].mxu0 }
 0x14e   :  { %v274_v43 = vpop.f32.mrb[9].mxu0 }
 0x14f   :  { %v938_v44 = vpop.f32.mrb[10].mxu0 }
 0x150   :  { %v310_v45 = vpack.c.bf16 %v938_v44, %v937_v42  ;;  %v277_v46 = vpop.f32.mrb[11].mxu0 }
 0x151   :  { %v309_v47 = vpack.c.bf16 %v277_v46, %v274_v43 }
 0x153   :  { %967 = vmatprep.mubr.bf16.mxu1 %v309_v47 }
 0x154   :  { %968 = vmatmul.mubr.bf16.gmra.mrb[8].mxu1 %v310_v45 }
 0x155   :  { %v941_v48 = vpop.f32.mrb[12].mxu0 }
 0x156   :  { %v290_v49 = vpop.f32.mrb[13].mxu0 }
 0x157   :  { %v942_v50 = vpop.f32.mrb[14].mxu0 }
 0x158   :  { %v312_v51 = vpack.c.bf16 %v942_v50, %v941_v48  ;;  %v293_v52 = vpop.f32.mrb[15].mxu0 }
 0x159   :  { %v311_v53 = vpack.c.bf16 %v293_v52, %v290_v49 }
 0x15b   :  { %971 = vmatprep.mubr.bf16.mxu1 %v311_v53 }
 0x15c   :  { %972 = vmatmul.mubr.bf16.gmra.mrb[12].mxu1 %v312_v51 }
 0x15d   :  { %1023 = vmatprep.mubr.bf16.mxu1 %v1316_v4 }
 0x217   :  { %v961_v57 = vpop.f32.mrb[0].mxu1 }
 0x218   :  { %v427_v58 = vadd.f32 %v961_v57, %v829_v56  ;;  %v418_v59 = vpop.f32.mrb[1].mxu1 }
 0x219   :  { %v419_v60 = vadd.f32 %v829_v56, %v418_v59  ;;  %v962_v61 = vpop.f32.mrb[2].mxu1 }
 0x21a   :  { %v430_v62 = vadd.f32 %v962_v61, %v829_v56  ;;  %v421_v63 = vpop.f32.mrb[3].mxu1  ;;  %v483_v1 = vmax.f32 %v427_v58, 0.0 }
 0x21b   :  { %v422_v0 = vadd.f32 %v829_v56, %v421_v63  ;;  %v481_v3 = vmax.f32 %v419_v60, 0.0 }
 0x21c   :  { %v484_v2 = vmax.f32 %v430_v62, 0.0 }
 0x21d   :  { %v482_v4 = vmax.f32 %v422_v0, 0.0 }
 0x21e   :  { %v498_v5 = vpack.c.bf16 %v484_v2, %v483_v1 }
 0x21f   :  { %v497_v6 = vpack.c.bf16 %v482_v4, %v481_v3  ;;  %v965_v7 = vpop.f32.mrb[4].mxu1 }
 0x220   :  { %v443_v8 = vadd.f32 %v965_v7, %v829_v56  ;;  %v434_v9 = vpop.f32.mrb[5].mxu1 }
 0x221   :  { %v435_v10 = vadd.f32 %v829_v56, %v434_v9  ;;  %v966_v11 = vpop.f32.mrb[6].mxu1  ;;  %991 = vmatprep.mubr.bf16.mxu0 %v497_v6 }
 0x222   :  { %v446_v12 = vadd.f32 %v966_v11, %v829_v56  ;;  %v437_v13 = vpop.f32.mrb[7].mxu1  ;;  %992 = vmatmul.mubr.bf16.vlgmr.msra.gmra.mrb[16].mxu0 %v498_v5  ;;  %v487_v17 = vmax.f32 %v443_v8, 0.0 }
 0x223   :  { %v438_v16 = vadd.f32 %v829_v56, %v437_v13  ;;  %v485_v24 = vmax.f32 %v435_v10, 0.0 }
 0x224   :  { %v488_v23 = vmax.f32 %v446_v12, 0.0 }
 0x225   :  { %v486_v25 = vmax.f32 %v438_v16, 0.0 }
 0x226   :  { %v500_v26 = vpack.c.bf16 %v488_v23, %v487_v17  ;;  %v846_v23 = vld [vmem:[%s1371_s5] ss:$0 sm:$0xff]  ;;  %s1204_s5 = smov [#allocation10]  }
 0x227   :  { %v499_v27 = vpack.c.bf16 %v486_v25, %v485_v24  ;;  %v969_v28 = vpop.f32.mrb[8].mxu1  ;;  %s799_s21 = sshll.u32 %s1204_s5, 4  ;;  %s800_s21 = int_to_ptr.vmem [resolvable:$true] %s799_s21 }
 0x228   :  { %v459_v29 = vadd.f32 %v969_v28, %v829_v56  ;;  %v450_v30 = vpop.f32.mrb[9].mxu1  ;;  %s1168_s22 = scalar_lea.vmem %s800_s21, 2048  ;;  %p1173_p5 = scmp.lt.s32.totalorder %s800_s21, %s800_s21 }
 0x229   :  { %v451_v31 = vadd.f32 %v829_v56, %v450_v30  ;;  %v970_v32 = vpop.f32.mrb[10].mxu1  ;;  %995 = vmatprep.mubr.bf16.mxu0 %v499_v27  ;;  %p1169_p4 = scmp.ne.s32.totalorder %s800_s21, %s1168_s22  ;;  %p1174_p6 = scmp.lt.s32.totalorder %s1168_s22, %s1168_s22 }
 0x22a   :  { %v462_v33 = vadd.f32 %v970_v32, %v829_v56  ;;  %v453_v34 = vpop.f32.mrb[11].mxu1  ;;  %996 = vmatmul.mubr.bf16.gmra.mrb[20].mxu0 %v500_v26  ;;  %v491_v36 = vmax.f32 %v459_v29, 0.0 }
 0x22b   :  { %v454_v35 = vadd.f32 %v829_v56, %v453_v34  ;;  %v489_v38 = vmax.f32 %v451_v31, 0.0  ;;  %p1175_p7 = por %p1174_p6, %p1173_p5 }
 0x22c   :  { %v492_v37 = vmax.f32 %v462_v33, 0.0 }
 0x22d   :  { %v490_v39 = vmax.f32 %v454_v35, 0.0  ;;  %p1176_p8 = pnand %p1175_p7, %p1169_p4 }
 0x22e   :  { %v502_v40 = vpack.c.bf16 %v492_v37, %v491_v36 }
 0x22f   :  { %v501_v41 = vpack.c.bf16 %v490_v39, %v489_v38  ;;  %v973_v42 = vpop.f32.mrb[12].mxu1 }
 0x230   :  { %v475_v43 = vadd.f32 %v973_v42, %v829_v56  ;;  %v466_v44 = vpop.f32.mrb[13].mxu1 }
 0x231   :  { %v467_v45 = vadd.f32 %v829_v56, %v466_v44  ;;  %v974_v46 = vpop.f32.mrb[14].mxu1  ;;  %999 = vmatprep.mubr.bf16.mxu0 %v501_v41 }
 0x232   :  { %v478_v47 = vadd.f32 %v974_v46, %v829_v56  ;;  %v469_v48 = vpop.f32.mrb[15].mxu1  ;;  %1000 = vmatmul.mubr.bf16.gmra.mrb[24].mxu0 %v502_v40  ;;  %v495_v50 = vmax.f32 %v475_v43, 0.0 }
 0x233   :  { %v470_v49 = vadd.f32 %v829_v56, %v469_v48  ;;  %v493_v52 = vmax.f32 %v467_v45, 0.0 }
 0x234   :  { %v496_v51 = vmax.f32 %v478_v47, 0.0 }
 0x235   :  { %v494_v53 = vmax.f32 %v470_v49, 0.0 }
 0x236   :  { %v504_v54 = vpack.c.bf16 %v496_v51, %v495_v50 }
 0x237   :  { %v503_v55 = vpack.c.bf16 %v494_v53, %v493_v52 }
 0x239   :  { %1003 = vmatprep.mubr.bf16.mxu0 %v503_v55 }
 0x23a   :  { %1004 = vmatmul.mubr.bf16.gmra.mrb[28].mxu0 %v504_v54 }
 0x2f5   :  { %v993_v57 = vpop.f32.mrb[16].mxu0 }
 0x2f6   :  { %v603_v58 = vpop.f32.mrb[17].mxu0 }
 0x2f7   :  { %v994_v59 = vpop.f32.mrb[18].mxu0 }
 0x2f8   :  { %v667_v60 = vpack.c.bf16 %v994_v59, %v993_v57  ;;  %v606_v61 = vpop.f32.mrb[19].mxu0 }
 0x2f9   :  { %v666_v62 = vpack.c.bf16 %v606_v61, %v603_v58 }
 0x2fb   :  { %1007 = vmatprep.subr.bf16.mxu1 %v666_v62 }
 0x2fc   :  { %1008 = vmatpush3.bf16.msra.mxu1 %v666_v62 }
 0x2fd   :  { %v997_v63 = vpop.f32.mrb[20].mxu0  ;;  %1009 = vmatprep.subr.bf16.mxu1 %v667_v60 }
 0x2fe   :  { %v619_v0 = vpop.f32.mrb[21].mxu0 }
 0x2ff   :  { %v998_v56 = vpop.f32.mrb[22].mxu0 }
 0x300   :  { %v669_v1 = vpack.c.bf16 %v998_v56, %v997_v63  ;;  %v622_v2 = vpop.f32.mrb[23].mxu0  ;;  %1010 = vmatpush3.bf16.msra.mxu1 %v667_v60 }
 0x301   :  { %v668_v3 = vpack.c.bf16 %v622_v2, %v619_v0 }
 0x303   :  { %1011 = vmatprep.subr.bf16.mxu1 %v668_v3 }
 0x304   :  { %1012 = vmatpush3.bf16.msra.mxu1 %v668_v3 }
 0x305   :  { %v1001_v4 = vpop.f32.mrb[24].mxu0  ;;  %1013 = vmatprep.subr.bf16.mxu1 %v669_v1 }
 0x306   :  { %v635_v5 = vpop.f32.mrb[25].mxu0 }
 0x307   :  { %v1002_v6 = vpop.f32.mrb[26].mxu0 }
 0x308   :  { %v671_v7 = vpack.c.bf16 %v1002_v6, %v1001_v4  ;;  %v638_v8 = vpop.f32.mrb[27].mxu0  ;;  %1014 = vmatpush3.bf16.msra.mxu1 %v669_v1 }
 0x309   :  { %v670_v9 = vpack.c.bf16 %v638_v8, %v635_v5 }
 0x30b   :  { %1015 = vmatprep.subr.bf16.mxu1 %v670_v9 }
 0x30c   :  { %1016 = vmatpush3.bf16.msra.mxu1 %v670_v9 }
 0x30d   :  { %v1005_v10 = vpop.f32.mrb[28].mxu0  ;;  %1017 = vmatprep.subr.bf16.mxu1 %v671_v7 }
 0x30e   :  { %v651_v11 = vpop.f32.mrb[29].mxu0 }
 0x30f   :  { %v1006_v12 = vpop.f32.mrb[30].mxu0 }
 0x310   :  { %v673_v13 = vpack.c.bf16 %v1006_v12, %v1005_v10  ;;  %v654_v16 = vpop.f32.mrb[31].mxu0  ;;  %1018 = vmatpush3.bf16.msra.mxu1 %v671_v7 }
 0x311   :  { %v672_v17 = vpack.c.bf16 %v654_v16, %v651_v11 }
 0x313   :  { %1019 = vmatprep.subr.bf16.mxu1 %v672_v17 }
 0x314   :  { %1020 = vmatpush3.bf16.msra.mxu1 %v672_v17 }
 0x315   :  { %1021 = vmatprep.subr.bf16.mxu1 %v673_v13 }
 0x318   :  { %1022 = vmatpush3.bf16.msra.mxu1 %v673_v13 }
 0x31b   :  { %1024 = vmatmul.mubr.bf16.vlgmr.msra.gmra.mrb[16].mxu1 %v1319_v14 }
 0x31c   :  { %1027 = vmatprep.mubr.bf16.mxu1 %v1321_v15 }
 0x323   :  { %1028 = vmatmul.mubr.bf16.gmra.mrb[20].mxu1 %v1325_v18 }
 0x324   :  { %1031 = vmatprep.mubr.bf16.mxu1 %v1327_v19 }
 0x32b   :  { %1032 = vmatmul.mubr.bf16.gmra.mrb[24].mxu1 %v1331_v20 }
 0x32c   :  { %1035 = vmatprep.mubr.bf16.mxu1 %v1333_v21 }
 0x333   :  { %1036 = vmatmul.mubr.bf16.gmra.mrb[28].mxu1 %v1337_v22 }
 0x3ee   :  { %v1025_v24 = vpop.f32.mrb[16].mxu1 }
 0x3ef   :  { %v724_v25 = vadd.f32 %v1025_v24, %v846_v23  ;;  %v715_v26 = vpop.f32.mrb[17].mxu1 }
 0x3f0   :  { %v716_v14 = vadd.f32 %v846_v23, %v715_v26  ;;  %v1026_v27 = vpop.f32.mrb[18].mxu1 }
 0x3f1   :  { %780 = vst [vmem:[#allocation10 + $0x10] sm:$0xff] %v724_v25  ;;  %v727_v15 = vadd.f32 %v1026_v27, %v846_v23  ;;  %v718_v18 = vpop.f32.mrb[19].mxu1 }
 0x3f2   :  { %778 = vst [vmem:[#allocation10] sm:$0xff] %v716_v14  ;;  %v719_v19 = vadd.f32 %v846_v23, %v718_v18 }
 0x3f3   :  { %781 = vst [vmem:[#allocation10 + $0x18] sm:$0xff] %v727_v15 }
 0x3f4   :  { %779 = vst [vmem:[#allocation10 + $0x8] sm:$0xff] %v719_v19 }
 0x3f6   :  { %v1029_v20 = vpop.f32.mrb[20].mxu1 }
 0x3f7   :  { %v740_v21 = vadd.f32 %v1029_v20, %v846_v23  ;;  %v731_v28 = vpop.f32.mrb[21].mxu1 }
 0x3f8   :  { %v732_v22 = vadd.f32 %v846_v23, %v731_v28  ;;  %v1030_v29 = vpop.f32.mrb[22].mxu1 }
 0x3f9   :  { %784 = vst [vmem:[#allocation10 + $0x30] sm:$0xff] %v740_v21  ;;  %v743_v30 = vadd.f32 %v1030_v29, %v846_v23  ;;  %v734_v31 = vpop.f32.mrb[23].mxu1 }
 0x3fa   :  { %782 = vst [vmem:[#allocation10 + $0x20] sm:$0xff] %v732_v22  ;;  %v735_v32 = vadd.f32 %v846_v23, %v734_v31 }
 0x3fb   :  { %785 = vst [vmem:[#allocation10 + $0x38] sm:$0xff] %v743_v30 }
 0x3fc   :  { %783 = vst [vmem:[#allocation10 + $0x28] sm:$0xff] %v735_v32 }
 0x3fe   :  { %v1033_v33 = vpop.f32.mrb[24].mxu1 }
 0x3ff   :  { %v756_v34 = vadd.f32 %v1033_v33, %v846_v23  ;;  %v747_v35 = vpop.f32.mrb[25].mxu1 }
 0x400   :  { %v748_v36 = vadd.f32 %v846_v23, %v747_v35  ;;  %v1034_v37 = vpop.f32.mrb[26].mxu1 }
 0x401   :  { %788 = vst [vmem:[#allocation10 + $0x50] sm:$0xff] %v756_v34  ;;  %v759_v38 = vadd.f32 %v1034_v37, %v846_v23  ;;  %v750_v39 = vpop.f32.mrb[27].mxu1 }
 0x402   :  { %786 = vst [vmem:[#allocation10 + $0x40] sm:$0xff] %v748_v36  ;;  %v751_v40 = vadd.f32 %v846_v23, %v750_v39 }
 0x403   :  { %789 = vst [vmem:[#allocation10 + $0x58] sm:$0xff] %v759_v38 }
 0x404   :  { %787 = vst [vmem:[#allocation10 + $0x48] sm:$0xff] %v751_v40 }
 0x406   :  { %v1037_v41 = vpop.f32.mrb[28].mxu1 }
 0x407   :  { %v772_v42 = vadd.f32 %v1037_v41, %v846_v23  ;;  %v763_v43 = vpop.f32.mrb[29].mxu1 }
 0x408   :  { %v764_v44 = vadd.f32 %v846_v23, %v763_v43  ;;  %v1038_v45 = vpop.f32.mrb[30].mxu1 }
 0x409   :  { %792 = vst [vmem:[#allocation10 + $0x70] sm:$0xff] %v772_v42  ;;  %v775_v46 = vadd.f32 %v1038_v45, %v846_v23  ;;  %v766_v47 = vpop.f32.mrb[31].mxu1 }
 0x40a   :  { %790 = vst [vmem:[#allocation10 + $0x60] sm:$0xff] %v764_v44  ;;  %v767_v48 = vadd.f32 %v846_v23, %v766_v47 }
 0x40b   :  { %793 = vst [vmem:[#allocation10 + $0x78] sm:$0xff] %v775_v46 }
 0x40c   :  { %791 = vst [vmem:[#allocation10 + $0x68] sm:$0xff] %v767_v48 }
 0x40d   :  { %1179 = shalt.err (!%p1176_p8)
}
 0x40e   :  { %s1180_s26 = scalar_lea.hbm %s1372_s6, 2048 }
 0x40f   :  { %p1181_p9 = scmp.ne.s32.totalorder %s1372_s6, %s1180_s26  ;;  %p1184_p10 = scmp.lt.u32.totalorder %s1180_s26, %s1372_s6 }
 0x411   :  { %p1186_p11 = pnand %p1184_p10, %p1181_p9 }
 0x413   :  { %1189 = shalt.err (!%p1186_p11)
}
 0x414   :  { %s1205_s7 = smov 128   ;;  %s1206_s8 = smov 8  }
 0x415   :  { %805 = dma.vmem_to_hbm [thread:$0]  %s800_s21, 2048, %s1372_s6, [#allocation4], %s1205_s7, %s1205_s7, %s1206_s8  }
 0x416   :  { %1196 = dma.done.wait [#allocation4], 2048  }
 0x417   :  { %1197 = vsyncadd [#allocation4], 4294965248 }
 0x418   :  { %809 = vsyncpa [#allocation3], 1 }
 0x419   :  { %810 = vsyncpa [#allocation6], 1 }
 0x41a   :  { %811 = vsyncpa [#allocation9], 1 }
 0x41b   :  { %812 = vsyncpa [#allocation4], 1 }

</bundles_post_ra>
